<compile_context>
chip_gen: v7x
topology: tpu7x:2x2x1
jax: 0.10.0
libtpu: 0.0.40
codegen_flags: <defaults>
</compile_context>

<pallas_src>
import functools

import jax
import jax.numpy as jnp
from jax.experimental import pallas as pl
from jax.experimental.pallas import tpu as pltpu


# --------------------------- kernel 1: mean pool ---------------------------
def _pool_sum_kernel(feat_ref, out_ref):
    """Accumulate per-channel sums of one (1, C, T_HW) feature block."""
    t = pl.program_id(1)

    @pl.when(t == 0)
    def _():
        out_ref[...] = jnp.zeros_like(out_ref)

    x = feat_ref[0].astype(jnp.float32)                    # (C, T_HW)
    out_ref[0] = out_ref[0] + jnp.sum(x, axis=-1, keepdims=True)   # (C, 1)


def _pick_hw_tile(hw, c, itemsize, budget_bytes=2 * 1024 * 1024):
    """Largest HW tile that divides HW, is a multiple of 128 (or == HW), and
    keeps one (C, tile) input block under ~budget_bytes of VMEM."""
    if c * hw * itemsize <= budget_bytes:
        return hw
    t = (budget_bytes // (c * itemsize)) // 128 * 128
    while t >= 128:
        if hw % t == 0:
            return t
        t -= 128
    return hw  # fallback: no aligned divisor found; take the whole row


# -------------------- kernel 2: cosine-sim softmax loss --------------------
def _cosine_softmax_loss_kernel(pooled_ref, lab_col_ref, lab_row_ref, loss_ref,
                                *, inv_hw, inv_temp):
    f = pooled_ref[...].astype(jnp.float32) * inv_hw       # (B, C) mean-pooled
    # F.cosine_similarity eps=1e-8 clamp on the norm product: clamp each
    # squared norm at 1e-8 (i.e. each norm at 1e-4) before normalizing.
    sq = jnp.sum(f * f, axis=-1, keepdims=True)            # (B, 1)
    fn = f * jax.lax.rsqrt(jnp.maximum(sq, 1e-8))          # row-normalized
    sim = jax.lax.dot_general(                              # (B, B) = fn @ fn.T
        fn, fn, (((1,), (1,)), ((), ())),
        preferred_element_type=jnp.float32,
        precision=jax.lax.Precision.HIGHEST)
    e = jnp.exp(sim * inv_temp)                             # (B, B)
    mask = lab_col_ref[...] == lab_row_ref[...]             # (B, B) same-label
    pos = jnp.sum(jnp.where(mask, e, 0.0), axis=-1, keepdims=True)  # (B, 1)
    tot = jnp.sum(e, axis=-1, keepdims=True)                         # (B, 1)
    per_row = jnp.log(tot) - jnp.log(pos)                   # -log(pos / tot)
    nb = per_row.shape[0]
    loss_ref[...] = jnp.sum(per_row, axis=0, keepdims=True) * (1.0 / nb)


# -------------------------------- wrapper ----------------------------------
def contrastive_loss(features, labels, temperature=0.5):
    """Pallas implementation of ContrastiveLoss.forward. Returns scalar loss."""
    B, C, H, W = features.shape
    HW = H * W

    # metadata-only reshape (contiguous): no extra HBM pass
    feats = features.reshape(B, C, HW)
    t_hw = _pick_hw_tile(HW, C, features.dtype.itemsize)
    n_t = HW // t_hw

    pooled = pl.pallas_call(
        _pool_sum_kernel,
        out_shape=jax.ShapeDtypeStruct((B, C, 1), jnp.float32),
        grid_spec=pltpu.PrefetchScalarGridSpec(
            num_scalar_prefetch=0,
            grid=(B, n_t),
            in_specs=[pl.BlockSpec((1, C, t_hw), lambda b, t: (b, 0, t))],
            out_specs=pl.BlockSpec((1, C, 1), lambda b, t: (b, 0, 0)),
        ),
        compiler_params=pltpu.CompilerParams(
            dimension_semantics=("parallel", "arbitrary"),
            vmem_limit_bytes=32 * 1024 * 1024),
        cost_estimate=pl.CostEstimate(
            flops=int(B * C * HW),
            transcendentals=0,
            bytes_accessed=int(feats.size * feats.dtype.itemsize + B * C * 4)),
    )(feats)

    pooled2d = pooled.reshape(B, C)                          # metadata-only
    lab = jnp.asarray(labels).reshape(-1).astype(jnp.int32)
    lab_col = lab.reshape(B, 1)
    lab_row = lab.reshape(1, B)

    # TODO(synk): the PyTorch source writes `exp_sim[labels].sum(1)`, which is
    # ill-formed as written (boolean-mask indexing yields a 1-D tensor, so
    # .sum(1) raises).  We implement the intended per-row masked sum
    # (exp_sim * same_label_mask).sum(1).
    loss_mat = pl.pallas_call(
        functools.partial(_cosine_softmax_loss_kernel,
                          inv_hw=1.0 / float(HW),
                          inv_temp=1.0 / float(temperature)),
        out_shape=jax.ShapeDtypeStruct((1, 1), jnp.float32),
        grid_spec=pltpu.PrefetchScalarGridSpec(
            num_scalar_prefetch=0,
            grid=(1,),
            in_specs=[pl.BlockSpec((B, C), lambda i: (0, 0)),
                      pl.BlockSpec((B, 1), lambda i: (0, 0)),
                      pl.BlockSpec((1, B), lambda i: (0, 0))],
            out_specs=pl.BlockSpec((1, 1), lambda i: (0, 0)),
        ),
        compiler_params=pltpu.CompilerParams(
            dimension_semantics=("arbitrary",)),
    )(pooled2d, lab_col, lab_row)

    return loss_mat[0, 0]


# ---------------- pure-JAX reference (PyTorch semantics) -------------------
def _ref_contrastive_loss(features, labels, temperature=0.5):
    f = features.astype(jnp.float32).mean(axis=(2, 3))       # (B, C)
    dots = jnp.dot(f, f.T, precision=jax.lax.Precision.HIGHEST)
    n = jnp.sqrt(jnp.sum(f * f, axis=1))
    sim = dots / jnp.maximum(n[:, None] * n[None, :], 1e-8)
    e = jnp.exp(sim / temperature)
    lab = labels.reshape(-1)
    mask = lab[:, None] == lab[None, :]
    pos = jnp.sum(jnp.where(mask, e, 0.0), axis=1)
    tot = jnp.sum(e, axis=1)
    return jnp.mean(-jnp.log(pos / tot))


if __name__ == "__main__":
    key = jax.random.PRNGKey(0)
    kf, kl = jax.random.split(key)
    B, C, H, W = 4, 8, 16, 16
    features = jax.random.uniform(kf, (B, C, H, W), jnp.float32)
    labels = jax.random.randint(kl, (B,), 0, 2, dtype=jnp.int32)

    loss = contrastive_loss(features, labels, temperature=0.5)
    loss = jax.block_until_ready(loss)

    ref = _ref_contrastive_loss(features, labels, temperature=0.5)
    assert jnp.allclose(loss, ref, rtol=1e-4, atol=1e-5), (loss, ref)

    print("KERNEL_OK")
</pallas_src>

<mosaic_0001>
module attributes {stable_mosaic.version = 11 : i64} {
  func.func @_pool_sum_kernel(%arg0: i32, %arg1: i32, %arg2: memref<1x8x256xf32, #tpu.memory_space<vmem>>, %arg3: memref<1x8x1xf32, #tpu.memory_space<vmem>>) attributes {dimension_semantics = [#tpu.dimension_semantics<parallel>, #tpu.dimension_semantics<arbitrary>], iteration_bounds = array<i64: 4, 1>, scalar_prefetch = 0 : i64, scratch_operands = 0 : i64, tpu.core_type = #tpu.core_type<tc>, window_params = [{transform_indices = @transform_0, window_bounds = array<i64: 1, 8, 256>}, {transform_indices = @transform_1, window_bounds = array<i64: 1, 8, 1>}]} {
    %c0_i32 = arith.constant 0 : i32
    %0 = arith.cmpi eq, %arg1, %c0_i32 : i32
    %1 = arith.extui %0 : i1 to i32
    %c0_i32_0 = arith.constant 0 : i32
    %2 = arith.cmpi ne, %1, %c0_i32_0 : i32
    scf.if %2 {
      %cst_9 = arith.constant 0.000000e+00 : f32
      %13 = vector.broadcast %cst_9 : f32 to vector<1x8x1xf32>
      %c0_10 = arith.constant 0 : index
      %c0_11 = arith.constant 0 : index
      %c0_12 = arith.constant 0 : index
      %14 = vector.load %arg3[%c0_10, %c0_11, %c0_12] : memref<1x8x1xf32, #tpu.memory_space<vmem>>, vector<1x8x1xf32>
      tpu.vector_store %arg3[%c0_10, %c0_11, %c0_12], %13 {strides = array<i32>} : memref<1x8x1xf32, #tpu.memory_space<vmem>>, vector<1x8x1xf32>,
    } else {
    }
    %c0 = arith.constant 0 : index
    %c0_1 = arith.constant 0 : index
    %c0_2 = arith.constant 0 : index
    %3 = vector.load %arg2[%c0, %c0_1, %c0_2] : memref<1x8x256xf32, #tpu.memory_space<vmem>>, vector<1x8x256xf32>
    %4 = vector.shape_cast %3 : vector<1x8x256xf32> to vector<8x256xf32>
    %c0_3 = arith.constant 0 : index
    %c0_4 = arith.constant 0 : index
    %c0_5 = arith.constant 0 : index
    %5 = vector.load %arg3[%c0_3, %c0_4, %c0_5] : memref<1x8x1xf32, #tpu.memory_space<vmem>>, vector<1x8x1xf32>
    %6 = vector.shape_cast %5 : vector<1x8x1xf32> to vector<8x1xf32>
    %cst = arith.constant dense<0.000000e+00> : vector<8xf32>
    %7 = vector.multi_reduction <add>, %4, %cst [1] : vector<8x256xf32> to vector<8xf32>
    %8 = vector.shape_cast %7 : vector<8xf32> to vector<8x1xf32>
    %9 = arith.addf %6, %8 : vector<8x1xf32>
    %c0_6 = arith.constant 0 : index
    %c0_7 = arith.constant 0 : index
    %c0_8 = arith.constant 0 : index
    %10 = vector.load %arg3[%c0_6, %c0_7, %c0_8] : memref<1x8x1xf32, #tpu.memory_space<vmem>>, vector<1x8x1xf32>
    %11 = vector.shape_cast %10 : vector<1x8x1xf32> to vector<8x1xf32>
    %12 = vector.shape_cast %9 : vector<8x1xf32> to vector<1x8x1xf32>
    tpu.vector_store %arg3[%c0_6, %c0_7, %c0_8], %12 {strides = array<i32>} : memref<1x8x1xf32, #tpu.memory_space<vmem>>, vector<1x8x1xf32>,
    return
  }
  func.func @transform_0(%arg0: i32, %arg1: i32) -> (i32, i32, i32) {
    %c0_i32 = arith.constant 0 : i32
    %c0_i32_0 = arith.constant 0 : i32
    return %arg0, %c0_i32, %arg1 : i32, i32, i32
  }
  func.func @transform_1(%arg0: i32, %arg1: i32) -> (i32, i32, i32) {
    %c0_i32 = arith.constant 0 : i32
    %c0_i32_0 = arith.constant 0 : i32
    %c0_i32_1 = arith.constant 0 : i32
    return %arg0, %c0_i32, %c0_i32_0 : i32, i32, i32
  }
}

</mosaic_0001>

<bundles_post_ra>
// kernel: tpu_custom_call.1
= control target key start
LH: loop header
LB: loop body
LE: loop exit
PB: predicated region body
PF: predicated region fallthrough
CT: control target
= control target key end

     0   :  { %6 = vsyncpa [#allocation3], 0  ;;  %s529_s0 = inlined_call_operand.hbm [shape: f32[4,8,256], index: 0, kind: input, shape index: {}]   ;;  %s530_s1 = inlined_call_operand.vmem [shape: f32[4,8,1], index: 1, kind: output, shape index: {}]  }
   0x1   :  { %8 = vsyncpa [#allocation3 + $0x1], 0  ;;  %s404_s6 = smov 0   ;;  %s406_s7 = smov 0  }
   0x2   :  { %s408_s8 = smov 0   ;;  %s410_s9 = smov 0  }
   0x3   :  { %s412_s10 = smov 0   ;;  %s414_s11 = smov 0  }
   0x4 LB: > { %s241_s12 = sadd.s32 4294967295, %s390_s11   ;;  %s26_s13 = sadd.s32 1, %s386_s10  ;;  %s390_s11 = sphi %s414_s11, %s14_s11   ;;  %s386_s10 = sphi %s412_s10, %s540_s10   ;;  %s382_s9 = sphi %s410_s9, %s539_s9   ;;  %s378_s8 = sphi %s408_s8, %s538_s8   ;;  %s374_s7 = sphi %s406_s7, %s537_s7   ;;  %s370_s6 = sphi %s404_s6, %s536_s6  }
   0x5   : > { %p28_p0 = scmp.ge.s32.totalorder %s26_s13, 4  ;;  %s35_s14 = sadd.s32 1, %s378_s8 }
   0x6   : > { %p42_p1 = scmp.ne.s32.totalorder %s378_s8, %s374_s7  ;;  %p43_p2 = scmp.eq.s32.totalorder %s390_s11, 0 }
   0x7   : > { %s542_s13 = smov (%p28_p0, %s26_s13), 0  ;;  %p48_p4 = scmp.ne.s32.totalorder %s374_s7, %s370_s6 }
   0x8   : > { %p440_p3 = por %p43_p2, %p42_p1  ;;  %s30_s16 = ssub.s32 %s386_s10, %s542_s13 }
   0x9   : > { %p49_p5 = scmp.eq.s32.totalorder %s241_s12, 0  ;;  %p33_p6 = scmp.eq.s32.totalorder %s30_s16, 0 }
   0xa   : > { %p260_p8 = scmp.lt.s32.totalorder %s390_s11, 4  ;;  %s98_s19 = sand.u32 1, %s378_s8  }
   0xb   : > { %p447_p7 = por %p49_p5, %p48_p4  ;;  %s253_s20 = sshll.u32 %s386_s10, 8 }
   0xc   : > { %s453_s18 = scalar_select %p33_p6, %s378_s8, %s35_s14  }
   0xd   : > { %s245_s21 = sshll.u32 %s98_s19, 4  ;;  %s460_s24 = scalar_lea.hbm %s529_s0, %s253_s20 }
   0xe   : > { %s102_s25 = scalar_lea.vmem [#allocation2], %s245_s21  ;;  %p464_p9 = pnand %p260_p8, %p440_p3 }
   0xf   : > { %s112_s26 = sshll.u32 %s102_s25, 4  ;;  %s99_s28 = scalar_lea.sflag [#allocation3], %s98_s19  ;;  %s468_s26 = int_to_ptr.vmem [resolvable:$true] %s112_s26 }
  0x10   : > { %s310_s29 = scalar_lea.hbm %s460_s24, 256  ;;  %p312_p13 = pneg %p464_p9 }
  0x11   : > { %p311_p12 = scmp.ne.s32.totalorder %s460_s24, %s310_s29  ;;  %s315_s3 = scalar_lea.hbm %s529_s0, 1024 }
  0x12   : > { %p316_p2 = scmp.lt.u32.totalorder %s460_s24, %s529_s0  ;;  %p317_p3 = scmp.lt.u32.totalorder %s315_s3, %s310_s29 }
  0x13   : > { %p313_p0 = pnand %p312_p13, %p311_p12  ;;  %p319_p5 = scmp.lt.u32.totalorder %s310_s29, %s460_s24 }
  0x14   : > { %p318_p4 = por %p317_p3, %p316_p2 }
  0x15   : > { %p314_p1 = pneg %p313_p0 }
  0x16   : > { %p320_p6 = por %p319_p5, %p318_p4 }
  0x18   : > { %p321_p8 = pnand %p320_p6, %p314_p1 }
  0x1a   : > { %324 = shalt.err (!%p321_p8)
}
  0x1b   : > { %s325_s6 = scalar_lea.vmem %s468_s26, 256  ;;  %s392_s12 = smov [#allocation2]  }
  0x1c   : > { %p326_p12 = scmp.ne.s32.totalorder %s468_s26, %s325_s6  ;;  %s330_s14 = sshll.u32 %s392_s12, 4  ;;  %s331_s14 = int_to_ptr.vmem [resolvable:$false] %s330_s14 }
  0x1d   : > { %s332_s15 = scalar_lea.vmem %s331_s14, 512  ;;  %p333_p11 = scmp.lt.s32.totalorder %s468_s26, %s331_s14 }
  0x1e   : > { %p328_p0 = pnand %p326_p12, %p312_p13  ;;  %p334_p2 = scmp.lt.s32.totalorder %s332_s15, %s325_s6 }
  0x20   : > { %p329_p10 = pneg %p328_p0  ;;  %p335_p3 = por %p334_p2, %p333_p11 }
  0x22   : > { %p336_p4 = pnand %p335_p3, %p329_p10 }
  0x24   : > { %339 = shalt.err (!%p336_p4)
}
  0x25   : > { %259 = dma.hbm_to_vmem [thread:$0]  (!%p464_p9), %s460_s24, 256, %s468_s26, %s99_s28  }
  0x26   : > { %p534_p1 = scmp.lt.s32.totalorder %s390_s11, 5  ;;  %p535_p5 = scmp.ge.s32.totalorder %s390_s11, 1 }
  0x28   : > { %p118_p13 = pnand %p535_p5, %p534_p1 }
  0x29   : > { %s123_s16 = sand.u32 (!%p118_p13), 1, %s374_s7  }
  0x2a   : > { %121 = sbr.rel (%p118_p13) target bundleno = 198 (0xc6), region = 24  ;;  %s249_s19 = sshll.u32 (!%p118_p13), %s123_s16, 4 }
  0x2b   : > { %s124_s20 = scalar_lea.sflag (!%p118_p13), [#allocation3], %s123_s16  ;;  %s127_s21 = scalar_lea.vmem (!%p118_p13), [#allocation2], %s249_s19 }
  0x31   : > { %365 = dma.done.wait (%p447_p7), %s124_s20, 256  }
  0x32   : > { %367 = vsyncadd (%p447_p7), %s124_s20, 4294967040  ;;  %p146_p10 = scmp.lt.s32.totalorder %s382_s9, 3  ;;  %vm154_vm0 = vcmask 7168   ;;  %v393_v0 = vmov 0.0   ;;  %v156_v1 = vld [vmem:[%s127_s21] sm:$0xff]  ;;  %v157_v2 = vld [vmem:[%s127_s21 + $0x8] sm:$0xff] }
  0x33   : > { %v159_v3 = vadd.f32 %v157_v2, %v156_v1 }
  0x34   : > { %s544_s9 = smov (!%p146_p10, %s382_s9), 3 }
  0x35   : > { %s250_s22 = sshll.u32 %s544_s9, 3  ;;  %160 = vadd.xlane.f32.xlu0 %v159_v3 }
  0x36   : > { %s149_s25 = scalar_lea.vmem %s530_s1, %s250_s22 }
  0x37   : > { %155 = vst.msk [vmem:[%s149_s25] sm:$0xff] %vm154_vm0, %v393_v0 }
  0x3e   : > { %v158_v4 = vld [vmem:[%s149_s25] sm:$0xff] }
  0xc2   : > { %v161_v5 = vpop.xlane.xlu0 %160 }
  0xc3   : > { %v162_v6 = vadd.f32 %v161_v5, %v158_v4 }
  0xc5   : > { %164 = vst.msk [vmem:[%s149_s25] sm:$0xff] %vm154_vm0, %v162_v6 }
  0xc6 PF: > { %s14_s11 = sadd.s32 1, %s390_s11   ;;  %s536_s6 = smov %s374_s7 }
  0xc7   : > { %p11_p7 = scmp.ge.s32.totalorder %s14_s11, 6   ;;  %s537_s7 = smov %s378_s8 }
  0xc8   : > { %s538_s8 = smov %s453_s18  ;;  %s539_s9 = smov %s386_s10 }
  0xc9   : > { %s540_s10 = smov %s542_s13  ;;  %13 = sbr.rel (!%p11_p7) target bundleno = 4 (0x4), region = 68 }
  0xd0   :  { %184 = vsyncpa [#allocation3], 1 }
  0xd1   :  { %186 = vsyncpa [#allocation3 + $0x1], 1 }

</bundles_post_ra>
